<compile_context>
chip_gen: v7x
topology: tpu7x:2x2x1
jax: 0.10.0
libtpu: 0.0.40
codegen_flags: <defaults>
</compile_context>

<pallas_src>
import functools

import jax
import jax.numpy as jnp
from jax import lax
from jax.experimental import pallas as pl
from jax.experimental.pallas import tpu as pltpu

# Model hyper-parameters (from the PyTorch module globals)
C = 204            # global_channels
L = 100            # global_points
S = 32             # global_spatial_sources
K = 7              # temporal conv kernel size
PAD = 3            # conv padding ("same")
POOL = 2           # global_conv_pool
NCLS = 2           # global_classes
KS = K * S         # 224 fused (tap, source) rows
LR = L + 1         # conv columns computed (extra column only feeds the dead pool shift)
LP = L + 2 * PAD + 1     # zero-padded input time axis (107)
FEAT = S * (L // POOL)   # 1600


def _varcnn_kernel(x_ref, wf_ref, bias_ref, w2_ref, b2_ref, o_ref, *, tb):
    """Fused VARCNN forward for `tb` samples.

    x_ref   : (tb, C, LP)   bf16 NCL input, time axis already zero-padded
    wf_ref  : (K*S, C)      bf16 fused spatial+conv weight, row index = k*S + o
    bias_ref: (S, LR)       f32 per-time-step conv bias (bc + valid-tap b1 terms)
    w2_ref  : (NCLS, S, L)  f32 head weights, odd time columns zeroed (maxpool folded in)
    b2_ref  : (1, NCLS)     f32 head bias
    o_ref   : (tb, NCLS)    f32 logits
    """
    # Small constants hoisted out of the batch loop (loaded once per grid step).
    bias = bias_ref[...]          # (S, LR)
    w2 = w2_ref[...]              # (NCLS, S, L)
    b2row = b2_ref[...]           # (1, NCLS)

    def body(b, carry):
        xb = x_ref[b]                                                     # (C, LP) bf16
        # Spatial Linear + all 7 conv taps in ONE deep bf16 MXU matmul (f32 accum).
        g = jnp.dot(wf_ref[...], xb, preferred_element_type=jnp.float32)  # (KS, LP) f32
        # "same" conv: padding already lives in x, so taps are plain shifted adds.
        acc = bias
        for k in range(K):
            acc = acc + g[k * S:(k + 1) * S, k:k + LR]                    # (S, LR)
        # ReLU + MaxPool(1,2): relu(max(a,b)) == max(relu(a),relu(b)); odd output
        # columns (incl. the LR-1 overhang) are killed by the zeroed head weights.
        m = jnp.maximum(jnp.maximum(acc[:, :L], acc[:, 1:L + 1]), 0.0)    # (S, L)
        # Output Linear(1600 -> 2): two masked weighted reductions (pool + channel-major
        # flatten are folded into w2), no lane-sparse feature tensor materialized.
        cols = []
        for c in range(NCLS):
            s = jnp.sum(m * w2[c], axis=1, keepdims=True)                 # (S, 1)
            cols.append(jnp.sum(s, axis=0, keepdims=True))                # (1, 1)
        row = jnp.concatenate(cols, axis=1) + b2row                       # (1, NCLS)
        o_ref[pl.ds(b, 1), :] = row
        return carry

    lax.fori_loop(0, tb, body, 0, unroll=2)


def _prepare_fused_params(params):
    """Fold spatial linear, conv taps, biases, maxpool selection and the channel-major
    flatten order into kernel-friendly tensors (tiny; plain XLA ops outside the kernel)."""
    w1, b1, wc, bc, w2, b2 = params
    # Wf[k*S + o, c] = sum_i W1[c, i] * Wc[k, i, o]  (bf16 for MXU throughput)
    wf = jnp.einsum('ci,kio->koc', w1, wc).reshape(KS, C).astype(jnp.bfloat16)
    # Per-time conv bias: bc + (b1 @ Wc[k]) summed only over taps that hit a real
    # (non-zero-padded) time step.  Column L (the pool-shift overhang) is dead.
    bb = jnp.einsum('zi,kio->ko', b1, wc)                               # (K, S)
    pos = jnp.arange(LR)[:, None] + jnp.arange(K)[None, :] - PAD        # (LR, K)
    valid = ((pos >= 0) & (pos < L)).astype(jnp.float32)
    bias_t = jnp.transpose(bc + valid @ bb)                             # (S, LR)
    # W2 rows are ordered s*(L//2)+t (channel-major flatten).  Expand to (NCLS, S, L)
    # with zeros on odd time columns so the pre-pool time axis can be reduced directly.
    w2_cs = jnp.transpose(w2.reshape(S, L // POOL, NCLS), (2, 0, 1))    # (NCLS, S, L//2)
    w2e = jnp.stack([w2_cs, jnp.zeros_like(w2_cs)], axis=-1).reshape(NCLS, S, L)
    return wf, bias_t, w2e, b2


def _pick_batch_tile(batch):
    if batch < 16:
        return max(batch, 1)          # single grid step, block == full array
    tb = 32                           # amortize per-step overhead
    while tb >= 16 and batch <= tb:   # keep >= 2 grid steps (megacore / v7x dual TC)
        tb //= 2
    return tb


def varcnn_forward(x_ncl, params):
    """x_ncl: (B, 204, 100) float32 (PyTorch NCL layout). Returns (B, 2) logits."""
    B = x_ncl.shape[0]
    wf, bias_t, w2e, b2 = _prepare_fused_params(params)

    tb = _pick_batch_tile(B)
    b_pad = pl.cdiv(B, tb) * tb
    # One fused pad+cast pass: batch pad to the tile, conv zero-pad on the time axis
    # (plus one extra dead column for the pool shift), bf16 input stream for the kernel.
    x = jnp.pad(x_ncl, ((0, b_pad - B), (0, 0), (PAD, LP - L - PAD))).astype(jnp.bfloat16)

    out = pl.pallas_call(
        functools.partial(_varcnn_kernel, tb=tb),
        out_shape=jax.ShapeDtypeStruct((b_pad, NCLS), jnp.float32),
        grid=(b_pad // tb,),
        in_specs=[
            pl.BlockSpec((tb, C, LP), lambda i: (i, 0, 0)),      # batch tile of padded input
            pl.BlockSpec((KS, C), lambda i: (0, 0)),             # fused spatial+conv weight
            pl.BlockSpec((S, LR), lambda i: (0, 0)),             # bias table
            pl.BlockSpec((NCLS, S, L), lambda i: (0, 0, 0)),     # head weights (pool folded)
            pl.BlockSpec((1, NCLS), lambda i: (0, 0)),           # head bias
        ],
        out_specs=pl.BlockSpec((tb, NCLS), lambda i: (i, 0)),
        compiler_params=pltpu.CompilerParams(
            dimension_semantics=("parallel",)),                   # batch axis is independent
    )(x, wf, bias_t, w2e, b2)
    return out[:B]


def varcnn_reference(x, params):
    """Pure-JAX mirror of the PyTorch module (numerical sanity check, f32 HIGHEST)."""
    w1, b1, wc, bc, w2, b2 = params
    hi = jax.lax.Precision.HIGHEST
    h = jnp.einsum('bcl,cs->bsl', x, w1, precision=hi) + b1[0][None, :, None]
    hp = jnp.pad(h, ((0, 0), (0, 0), (PAD, PAD)))
    conv = bc[0][None, :, None]
    for k in range(K):
        conv = conv + jnp.einsum('bil,io->bol', hp[:, :, k:k + L], wc[k], precision=hi)
    r = jnp.maximum(conv, 0.0)
    pooled = jnp.max(r.reshape(x.shape[0], S, L // POOL, POOL), axis=-1)
    flat = pooled.reshape(x.shape[0], FEAT)
    return jnp.dot(flat, w2, precision=hi) + b2


def init_params(key):
    ks = jax.random.split(key, 6)
    scale = 0.05
    w1 = scale * jax.random.normal(ks[0], (C, S), jnp.float32)        # Linear(204,32).weight.T
    b1 = scale * jax.random.normal(ks[1], (1, S), jnp.float32)
    wc = scale * jax.random.normal(ks[2], (K, S, S), jnp.float32)     # Conv1d weight, (k, c_in, c_out)
    bc = scale * jax.random.normal(ks[3], (1, S), jnp.float32)
    w2 = scale * jax.random.normal(ks[4], (FEAT, NCLS), jnp.float32)  # Linear(1600,2).weight.T
    b2 = scale * jax.random.normal(ks[5], (1, NCLS), jnp.float32)
    return (w1, b1, wc, bc, w2, b2)


if __name__ == "__main__":
    key = jax.random.PRNGKey(0)
    k_x, k_p = jax.random.split(key)

    B = 2
    x = jax.random.normal(k_x, (B, C, L), jnp.float32)   # (batch, 204 channels, 100 points)
    params = init_params(k_p)

    out = jax.jit(varcnn_forward)(x, params)
    out = jax.block_until_ready(out)
    assert out.shape == (B, NCLS) and out.dtype == jnp.float32

    ref = varcnn_reference(x, params)
    err = float(jnp.max(jnp.abs(out - ref)))
    assert bool(jnp.allclose(out, ref, atol=1e-1, rtol=1e-1)), (
        "mismatch, max |diff| = %f" % err)
    print("KERNEL_OK")
</pallas_src>

<mosaic_0001>
module attributes {stable_mosaic.version = 11 : i64} {
  func.func @_varcnn_kernel(%arg0: i32, %arg1: memref<2x204x107xbf16, #tpu.memory_space<vmem>>, %arg2: memref<224x204xbf16, #tpu.memory_space<vmem>>, %arg3: memref<32x101xf32, #tpu.memory_space<vmem>>, %arg4: memref<2x32x100xf32, #tpu.memory_space<vmem>>, %arg5: memref<1x2xf32, #tpu.memory_space<vmem>>, %arg6: memref<2x2xf32, #tpu.memory_space<vmem>>) attributes {dimension_semantics = [#tpu.dimension_semantics<parallel>], iteration_bounds = array<i64: 1>, scalar_prefetch = 0 : i64, scratch_operands = 0 : i64, tpu.core_type = #tpu.core_type<tc>, window_params = [{transform_indices = @transform_0, window_bounds = array<i64: 2, 204, 107>}, {pipeline_mode = #tpu.pipeline_mode<synchronous>, transform_indices = @transform_1, window_bounds = array<i64: 224, 204>}, {pipeline_mode = #tpu.pipeline_mode<synchronous>, transform_indices = @transform_2, window_bounds = array<i64: 32, 101>}, {pipeline_mode = #tpu.pipeline_mode<synchronous>, transform_indices = @transform_3, window_bounds = array<i64: 2, 32, 100>}, {pipeline_mode = #tpu.pipeline_mode<synchronous>, transform_indices = @transform_4, window_bounds = array<i64: 1, 2>}, {transform_indices = @transform_5, window_bounds = array<i64: 2, 2>}]} {
    %c0 = arith.constant 0 : index
    %c0_0 = arith.constant 0 : index
    %0 = vector.load %arg3[%c0, %c0_0] : memref<32x101xf32, #tpu.memory_space<vmem>>, vector<32x101xf32>
    %c0_1 = arith.constant 0 : index
    %c0_2 = arith.constant 0 : index
    %c0_3 = arith.constant 0 : index
    %1 = vector.load %arg4[%c0_1, %c0_2, %c0_3] : memref<2x32x100xf32, #tpu.memory_space<vmem>>, vector<2x32x100xf32>
    %c0_4 = arith.constant 0 : index
    %c0_5 = arith.constant 0 : index
    %2 = vector.load %arg5[%c0_4, %c0_5] : memref<1x2xf32, #tpu.memory_space<vmem>>, vector<1x2xf32>
    %c0_i32 = arith.constant 0 : i32
    %3 = arith.index_cast %c0_i32 : i32 to index
    %c0_6 = arith.constant 0 : index
    %c0_7 = arith.constant 0 : index
    %4 = vector.load %arg1[%3, %c0_6, %c0_7] : memref<2x204x107xbf16, #tpu.memory_space<vmem>>, vector<1x204x107xbf16>
    %5 = vector.shape_cast %4 : vector<1x204x107xbf16> to vector<204x107xbf16>
    %c0_8 = arith.constant 0 : index
    %c0_9 = arith.constant 0 : index
    %6 = vector.load %arg2[%c0_8, %c0_9] : memref<224x204xbf16, #tpu.memory_space<vmem>>, vector<224x204xbf16>
    %cst = arith.constant dense<0.000000e+00> : vector<224x107xf32>
    %7 = tpu.matmul %6, %5, %cst {dimension_numbers = #tpu.dot_dimension_numbers<[1], [0], [0], [1], [0, 0, 1, 1], [], []>} : vector<224x204xbf16>, vector<204x107xbf16>, vector<224x107xf32> -> vector<224x107xf32>
    %8 = vector.extract_strided_slice %7 {offsets = [0, 0], sizes = [32, 101], strides = [1, 1]} : vector<224x107xf32> to vector<32x101xf32>
    %9 = arith.addf %0, %8 : vector<32x101xf32>
    %10 = vector.extract_strided_slice %7 {offsets = [32, 1], sizes = [32, 101], strides = [1, 1]} : vector<224x107xf32> to vector<32x101xf32>
    %11 = arith.addf %9, %10 : vector<32x101xf32>
    %12 = vector.extract_strided_slice %7 {offsets = [64, 2], sizes = [32, 101], strides = [1, 1]} : vector<224x107xf32> to vector<32x101xf32>
    %13 = arith.addf %11, %12 : vector<32x101xf32>
    %14 = vector.extract_strided_slice %7 {offsets = [96, 3], sizes = [32, 101], strides = [1, 1]} : vector<224x107xf32> to vector<32x101xf32>
    %15 = arith.addf %13, %14 : vector<32x101xf32>
    %16 = vector.extract_strided_slice %7 {offsets = [128, 4], sizes = [32, 101], strides = [1, 1]} : vector<224x107xf32> to vector<32x101xf32>
    %17 = arith.addf %15, %16 : vector<32x101xf32>
    %18 = vector.extract_strided_slice %7 {offsets = [160, 5], sizes = [32, 101], strides = [1, 1]} : vector<224x107xf32> to vector<32x101xf32>
    %19 = arith.addf %17, %18 : vector<32x101xf32>
    %20 = vector.extract_strided_slice %7 {offsets = [192, 6], sizes = [32, 101], strides = [1, 1]} : vector<224x107xf32> to vector<32x101xf32>
    %21 = arith.addf %19, %20 : vector<32x101xf32>
    %22 = vector.extract_strided_slice %21 {offsets = [0, 0], sizes = [32, 100], strides = [1, 1]} : vector<32x101xf32> to vector<32x100xf32>
    %23 = vector.extract_strided_slice %21 {offsets = [0, 1], sizes = [32, 100], strides = [1, 1]} : vector<32x101xf32> to vector<32x100xf32>
    %24 = arith.maximumf %22, %23 : vector<32x100xf32>
    %cst_10 = arith.constant 0.000000e+00 : f32
    %25 = vector.broadcast %cst_10 : f32 to vector<32x100xf32>
    %26 = arith.maximumf %24, %25 : vector<32x100xf32>
    %27 = vector.extract_strided_slice %1 {offsets = [0, 0, 0], sizes = [1, 32, 100], strides = [1, 1, 1]} : vector<2x32x100xf32> to vector<1x32x100xf32>
    %28 = vector.shape_cast %27 : vector<1x32x100xf32> to vector<32x100xf32>
    %29 = arith.mulf %26, %28 : vector<32x100xf32>
    %cst_11 = arith.constant dense<0.000000e+00> : vector<32xf32>
    %30 = vector.multi_reduction <add>, %29, %cst_11 [1] : vector<32x100xf32> to vector<32xf32>
    %31 = vector.shape_cast %30 : vector<32xf32> to vector<32x1xf32>
    %cst_12 = arith.constant dense<0.000000e+00> : vector<1xf32>
    %32 = vector.multi_reduction <add>, %31, %cst_12 [0] : vector<32x1xf32> to vector<1xf32>
    %33 = vector.shape_cast %32 : vector<1xf32> to vector<1x1xf32>
    %34 = vector.extract_strided_slice %1 {offsets = [1, 0, 0], sizes = [1, 32, 100], strides = [1, 1, 1]} : vector<2x32x100xf32> to vector<1x32x100xf32>
    %35 = vector.shape_cast %34 : vector<1x32x100xf32> to vector<32x100xf32>
    %36 = arith.mulf %26, %35 : vector<32x100xf32>
    %cst_13 = arith.constant dense<0.000000e+00> : vector<32xf32>
    %37 = vector.multi_reduction <add>, %36, %cst_13 [1] : vector<32x100xf32> to vector<32xf32>
    %38 = vector.shape_cast %37 : vector<32xf32> to vector<32x1xf32>
    %cst_14 = arith.constant dense<0.000000e+00> : vector<1xf32>
    %39 = vector.multi_reduction <add>, %38, %cst_14 [0] : vector<32x1xf32> to vector<1xf32>
    %40 = vector.shape_cast %39 : vector<1xf32> to vector<1x1xf32>
    %41 = tpu.concatenate %33, %40 in 1 : vector<1x1xf32>, vector<1x1xf32> -> vector<1x2xf32>
    %42 = arith.addf %41, %2 : vector<1x2xf32>
    %43 = arith.index_cast %c0_i32 : i32 to index
    %c0_15 = arith.constant 0 : index
    %44 = vector.load %arg6[%43, %c0_15] : memref<2x2xf32, #tpu.memory_space<vmem>>, vector<1x2xf32>
    tpu.vector_store %arg6[%43, %c0_15], %42 {strides = array<i32>} : memref<2x2xf32, #tpu.memory_space<vmem>>, vector<1x2xf32>,
    %c1_i32 = arith.constant 1 : i32
    %45 = arith.index_cast %c1_i32 : i32 to index
    %c0_16 = arith.constant 0 : index
    %c0_17 = arith.constant 0 : index
    %46 = vector.load %arg1[%45, %c0_16, %c0_17] : memref<2x204x107xbf16, #tpu.memory_space<vmem>>, vector<1x204x107xbf16>
    %47 = vector.shape_cast %46 : vector<1x204x107xbf16> to vector<204x107xbf16>
    %c0_18 = arith.constant 0 : index
    %c0_19 = arith.constant 0 : index
    %48 = vector.load %arg2[%c0_18, %c0_19] : memref<224x204xbf16, #tpu.memory_space<vmem>>, vector<224x204xbf16>
    %cst_20 = arith.constant dense<0.000000e+00> : vector<224x107xf32>
    %49 = tpu.matmul %48, %47, %cst_20 {dimension_numbers = #tpu.dot_dimension_numbers<[1], [0], [0], [1], [0, 0, 1, 1], [], []>} : vector<224x204xbf16>, vector<204x107xbf16>, vector<224x107xf32> -> vector<224x107xf32>
    %50 = vector.extract_strided_slice %49 {offsets = [0, 0], sizes = [32, 101], strides = [1, 1]} : vector<224x107xf32> to vector<32x101xf32>
    %51 = arith.addf %0, %50 : vector<32x101xf32>
    %52 = vector.extract_strided_slice %49 {offsets = [32, 1], sizes = [32, 101], strides = [1, 1]} : vector<224x107xf32> to vector<32x101xf32>
    %53 = arith.addf %51, %52 : vector<32x101xf32>
    %54 = vector.extract_strided_slice %49 {offsets = [64, 2], sizes = [32, 101], strides = [1, 1]} : vector<224x107xf32> to vector<32x101xf32>
    %55 = arith.addf %53, %54 : vector<32x101xf32>
    %56 = vector.extract_strided_slice %49 {offsets = [96, 3], sizes = [32, 101], strides = [1, 1]} : vector<224x107xf32> to vector<32x101xf32>
    %57 = arith.addf %55, %56 : vector<32x101xf32>
    %58 = vector.extract_strided_slice %49 {offsets = [128, 4], sizes = [32, 101], strides = [1, 1]} : vector<224x107xf32> to vector<32x101xf32>
    %59 = arith.addf %57, %58 : vector<32x101xf32>
    %60 = vector.extract_strided_slice %49 {offsets = [160, 5], sizes = [32, 101], strides = [1, 1]} : vector<224x107xf32> to vector<32x101xf32>
    %61 = arith.addf %59, %60 : vector<32x101xf32>
    %62 = vector.extract_strided_slice %49 {offsets = [192, 6], sizes = [32, 101], strides = [1, 1]} : vector<224x107xf32> to vector<32x101xf32>
    %63 = arith.addf %61, %62 : vector<32x101xf32>
    %64 = vector.extract_strided_slice %63 {offsets = [0, 0], sizes = [32, 100], strides = [1, 1]} : vector<32x101xf32> to vector<32x100xf32>
    %65 = vector.extract_strided_slice %63 {offsets = [0, 1], sizes = [32, 100], strides = [1, 1]} : vector<32x101xf32> to vector<32x100xf32>
    %66 = arith.maximumf %64, %65 : vector<32x100xf32>
    %cst_21 = arith.constant 0.000000e+00 : f32
    %67 = vector.broadcast %cst_21 : f32 to vector<32x100xf32>
    %68 = arith.maximumf %66, %67 : vector<32x100xf32>
    %69 = vector.extract_strided_slice %1 {offsets = [0, 0, 0], sizes = [1, 32, 100], strides = [1, 1, 1]} : vector<2x32x100xf32> to vector<1x32x100xf32>
    %70 = vector.shape_cast %69 : vector<1x32x100xf32> to vector<32x100xf32>
    %71 = arith.mulf %68, %70 : vector<32x100xf32>
    %cst_22 = arith.constant dense<0.000000e+00> : vector<32xf32>
    %72 = vector.multi_reduction <add>, %71, %cst_22 [1] : vector<32x100xf32> to vector<32xf32>
    %73 = vector.shape_cast %72 : vector<32xf32> to vector<32x1xf32>
    %cst_23 = arith.constant dense<0.000000e+00> : vector<1xf32>
    %74 = vector.multi_reduction <add>, %73, %cst_23 [0] : vector<32x1xf32> to vector<1xf32>
    %75 = vector.shape_cast %74 : vector<1xf32> to vector<1x1xf32>
    %76 = vector.extract_strided_slice %1 {offsets = [1, 0, 0], sizes = [1, 32, 100], strides = [1, 1, 1]} : vector<2x32x100xf32> to vector<1x32x100xf32>
    %77 = vector.shape_cast %76 : vector<1x32x100xf32> to vector<32x100xf32>
    %78 = arith.mulf %68, %77 : vector<32x100xf32>
    %cst_24 = arith.constant dense<0.000000e+00> : vector<32xf32>
    %79 = vector.multi_reduction <add>, %78, %cst_24 [1] : vector<32x100xf32> to vector<32xf32>
    %80 = vector.shape_cast %79 : vector<32xf32> to vector<32x1xf32>
    %cst_25 = arith.constant dense<0.000000e+00> : vector<1xf32>
    %81 = vector.multi_reduction <add>, %80, %cst_25 [0] : vector<32x1xf32> to vector<1xf32>
    %82 = vector.shape_cast %81 : vector<1xf32> to vector<1x1xf32>
    %83 = tpu.concatenate %75, %82 in 1 : vector<1x1xf32>, vector<1x1xf32> -> vector<1x2xf32>
    %84 = arith.addf %83, %2 : vector<1x2xf32>
    %85 = arith.index_cast %c1_i32 : i32 to index
    %c0_26 = arith.constant 0 : index
    %86 = vector.load %arg6[%85, %c0_26] : memref<2x2xf32, #tpu.memory_space<vmem>>, vector<1x2xf32>
    tpu.vector_store %arg6[%85, %c0_26], %84 {strides = array<i32>} : memref<2x2xf32, #tpu.memory_space<vmem>>, vector<1x2xf32>,
    %c2_i32 = arith.constant 2 : i32
    return
  }
  func.func @transform_0(%arg0: i32) -> (i32, i32, i32) {
    %c0_i32 = arith.constant 0 : i32
    %c0_i32_0 = arith.constant 0 : i32
    %c0_i32_1 = arith.constant 0 : i32
    return %arg0, %c0_i32, %c0_i32_0 : i32, i32, i32
  }
  func.func @transform_1(%arg0: i32) -> (i32, i32) {
    %c0_i32 = arith.constant 0 : i32
    %c0_i32_0 = arith.constant 0 : i32
    %c0_i32_1 = arith.constant 0 : i32
    return %c0_i32, %c0_i32_0 : i32, i32
  }
  func.func @transform_2(%arg0: i32) -> (i32, i32) {
    %c0_i32 = arith.constant 0 : i32
    %c0_i32_0 = arith.constant 0 : i32
    %c0_i32_1 = arith.constant 0 : i32
    return %c0_i32, %c0_i32_0 : i32, i32
  }
  func.func @transform_3(%arg0: i32) -> (i32, i32, i32) {
    %c0_i32 = arith.constant 0 : i32
    %c0_i32_0 = arith.constant 0 : i32
    %c0_i32_1 = arith.constant 0 : i32
    %c0_i32_2 = arith.constant 0 : i32
    return %c0_i32, %c0_i32_0, %c0_i32_1 : i32, i32, i32
  }
  func.func @transform_4(%arg0: i32) -> (i32, i32) {
    %c0_i32 = arith.constant 0 : i32
    %c0_i32_0 = arith.constant 0 : i32
    %c0_i32_1 = arith.constant 0 : i32
    return %c0_i32, %c0_i32_0 : i32, i32
  }
  func.func @transform_5(%arg0: i32) -> (i32, i32) {
    %c0_i32 = arith.constant 0 : i32
    %c0_i32_0 = arith.constant 0 : i32
    return %arg0, %c0_i32 : i32, i32
  }
}

</mosaic_0001>

<bundles_post_ra>
// kernel: varcnn_forward.1
= control target key start
LH: loop header
LB: loop body
LE: loop exit
PB: predicated region body
PF: predicated region fallthrough
CT: control target
= control target key end

     0   :  { %v1587_v1 = vmov 0   ;;  %vm292_vm0 = vcmask 621568   ;;  %vm335_vm1 = vcmask 1045504   ;;  %s1958_s0 = inlined_call_operand.vmem [shape: bf16[2,204,107], index: 0, kind: input, shape index: {}]   ;;  %s1959_s1 = inlined_call_operand.vmem [shape: bf16[224,204], index: 1, kind: input, shape index: {}]   ;;  %s1960_s2 = inlined_call_operand.vmem [shape: f32[32,101], index: 2, kind: input, shape index: {}]   ;;  %s1961_s3 = inlined_call_operand.vmem [shape: f32[2,32,100], index: 3, kind: input, shape index: {}]   ;;  %s1962_s4 = inlined_call_operand.vmem [shape: f32[1,2], index: 4, kind: input, shape index: {}]   ;;  %s1963_s5 = inlined_call_operand.hbm [shape: f32[2,2], index: 5, kind: output, shape index: {}]  }
   0x1   :  { %v1495_v0 = vld [vmem:[%s1958_s0] sm:$0xff]   ;;  %339 = vmatprep.subr.bf16.mxu0 %v1587_v1  ;;  %991 = vmatprep.subr.bf16.mxu1 %v1587_v1  ;;  %v1496_v2 = vld [vmem:[%s1958_s0 + $0x68] sm:$0xff]   ;;  %v1498_v4 = vld [vmem:[%s1958_s0 + $0x70] sm:$0xff]  }
   0x2   :  { %340 = vmatpush1.bf16.msra.mxu0 %v1495_v0  ;;  %v1497_v3 = vld [vmem:[%s1958_s0 + $0x8] sm:$0xff]   ;;  %992 = vmatpush1.bf16.msra.mxu1 %v1496_v2  ;;  %v1499_v5 = vld [vmem:[%s1958_s0 + $0x10] sm:$0xff]   ;;  %v1500_v6 = vld [vmem:[%s1958_s0 + $0x78] sm:$0xff]  }
   0x3   :  { %341 = vmatprep.subr.bf16.mxu0 %v1587_v1  ;;  %993 = vmatprep.subr.bf16.mxu1 %v1587_v1  ;;  %v1501_v7 = vld [vmem:[%s1958_s0 + $0x18] sm:$0xff]   ;;  %v1502_v8 = vld [vmem:[%s1958_s0 + $0x80] sm:$0xff]   ;;  %v1504_v10 = vld [vmem:[%s1958_s0 + $0x88] sm:$0xff]  }
   0x4   :  { %v1503_v9 = vld [vmem:[%s1958_s0 + $0x20] sm:$0xff]   ;;  %v1505_v11 = vld [vmem:[%s1958_s0 + $0x28] sm:$0xff]   ;;  %v1506_v12 = vld [vmem:[%s1958_s0 + $0x90] sm:$0xff]  }
   0x5   :  { %v1507_v13 = vld [vmem:[%s1958_s0 + $0x30] sm:$0xff]   ;;  %v1508_v14 = vld [vmem:[%s1958_s0 + $0x98] sm:$0xff]   ;;  %v1510_v16 = vld [vmem:[%s1958_s0 + $0xa0] sm:$0xff]  }
   0x6   :  { %342 = vmatpush1.bf16.msra.mxu0 %v1497_v3  ;;  %994 = vmatpush1.bf16.msra.mxu1 %v1498_v4  ;;  %v1509_v15 = vld [vmem:[%s1958_s0 + $0x38] sm:$0xff]   ;;  %v1523_v17 = vld [vmem:[%s1959_s1 + $0x4] ss:$8 sps:$4 sm:$0xff]   ;;  %v1514_v21 = vld [vmem:[%s1958_s0 + $0xb0] sm:$0xff]  }
   0x7   :  { %343 = vmatprep.subr.bf16.mxu0 %v1587_v1  ;;  %995 = vmatprep.subr.bf16.mxu1 %v1587_v1  ;;  %v1511_v18 = vld [vmem:[%s1958_s0 + $0x40] sm:$0xff]   ;;  %v1512_v19 = vld [vmem:[%s1958_s0 + $0xa8] sm:$0xff]   ;;  %v1515_v22 = vld [vmem:[%s1958_s0 + $0x50] sm:$0xff]  }
   0x8   :  { %1392 = vmatprep.mubr.msk.bf16.mxu0 %vm292_vm0, %v1523_v17  ;;  %1473 = vmatprep.mubr.msk.bf16.mxu1 %vm292_vm0, %v1523_v17  ;;  %v1513_v20 = vld [vmem:[%s1958_s0 + $0x48] sm:$0xff]   ;;  %v1516_v23 = vld [vmem:[%s1958_s0 + $0xb8] sm:$0xff]   ;;  %v1518_v25 = vld [vmem:[%s1958_s0 + $0xc0] sm:$0xff]  }
   0x9   :  { %v1517_v24 = vld [vmem:[%s1958_s0 + $0x58] sm:$0xff]   ;;  %v1519_v26 = vld [vmem:[%s1958_s0 + $0x60] sm:$0x3f]   ;;  %v1520_v27 = vld [vmem:[%s1958_s0 + $0xc8] sm:$0x3f]  }
   0xa   :  { %344 = vmatpush1.bf16.msra.mxu0 %v1499_v5  ;;  %996 = vmatpush1.bf16.msra.mxu1 %v1500_v6 }
   0xb   :  { %345 = vmatprep.subr.bf16.mxu0 %v1587_v1  ;;  %997 = vmatprep.subr.bf16.mxu1 %v1587_v1 }
   0xe   :  { %346 = vmatpush1.bf16.msra.mxu0 %v1501_v7  ;;  %998 = vmatpush1.bf16.msra.mxu1 %v1502_v8 }
   0xf   :  { %347 = vmatprep.subr.bf16.mxu0 %v1587_v1  ;;  %999 = vmatprep.subr.bf16.mxu1 %v1587_v1 }
  0x12   :  { %348 = vmatpush1.bf16.msra.mxu0 %v1503_v9  ;;  %1000 = vmatpush1.bf16.msra.mxu1 %v1504_v10 }
  0x13   :  { %349 = vmatprep.subr.bf16.mxu0 %v1587_v1  ;;  %1001 = vmatprep.subr.bf16.mxu1 %v1587_v1 }
  0x16   :  { %350 = vmatpush1.bf16.msra.mxu0 %v1505_v11  ;;  %1002 = vmatpush1.bf16.msra.mxu1 %v1506_v12 }
  0x17   :  { %351 = vmatprep.subr.bf16.mxu0 %v1587_v1  ;;  %1003 = vmatprep.subr.bf16.mxu1 %v1587_v1 }
  0x1a   :  { %352 = vmatpush1.bf16.msra.mxu0 %v1507_v13  ;;  %1004 = vmatpush1.bf16.msra.mxu1 %v1508_v14 }
  0x1b   :  { %353 = vmatprep.subr.bf16.mxu0 %v1587_v1  ;;  %1005 = vmatprep.subr.bf16.mxu1 %v1587_v1 }
  0x1e   :  { %354 = vmatpush1.bf16.msra.mxu0 %v1509_v15  ;;  %1006 = vmatpush1.bf16.msra.mxu1 %v1510_v16 }
  0x1f   :  { %355 = vmatprep.subr.bf16.mxu0 %v1587_v1  ;;  %1007 = vmatprep.subr.bf16.mxu1 %v1587_v1 }
  0x22   :  { %356 = vmatpush1.bf16.msra.mxu0 %v1511_v18  ;;  %1008 = vmatpush1.bf16.msra.mxu1 %v1512_v19 }
  0x23   :  { %357 = vmatprep.subr.bf16.mxu0 %v1587_v1  ;;  %1009 = vmatprep.subr.bf16.mxu1 %v1587_v1 }
  0x26   :  { %358 = vmatpush1.bf16.msra.mxu0 %v1513_v20  ;;  %1010 = vmatpush1.bf16.msra.mxu1 %v1514_v21 }
  0x27   :  { %359 = vmatprep.subr.bf16.mxu0 %v1587_v1  ;;  %1011 = vmatprep.subr.bf16.mxu1 %v1587_v1 }
  0x2a   :  { %360 = vmatpush1.bf16.msra.mxu0 %v1515_v22  ;;  %1012 = vmatpush1.bf16.msra.mxu1 %v1516_v23 }
  0x2b   :  { %361 = vmatprep.subr.bf16.mxu0 %v1587_v1  ;;  %1013 = vmatprep.subr.bf16.mxu1 %v1587_v1 }
  0x2c   :  { %10 = vsyncpa [#allocation3], 0  ;;  %v337_v28 = vsel %vm335_vm1, %v1519_v26, 0  ;;  %v989_v29 = vsel %vm335_vm1, %v1520_v27, 0  ;;  %v1521_v30 = vld [vmem:[%s1959_s1] ss:$8 sps:$4 sm:$0xff]  }
  0x2d   :  { %v1524_v31 = vld [vmem:[%s1959_s1 + $0x14] ss:$8 sps:$4 sm:$0xff]   ;;  %v1526_v32 = vld [vmem:[%s1959_s1 + $0x10] ss:$8 sps:$4 sm:$0xff]   ;;  %v1527_v33 = vld [vmem:[%s1959_s1 + $0x24] ss:$8 sps:$4 sm:$0xff]  }
  0x2e   :  { %362 = vmatpush1.bf16.msra.mxu0 %v1517_v24  ;;  %1014 = vmatpush1.bf16.msra.mxu1 %v1518_v25  ;;  %v1529_v34 = vld [vmem:[%s1959_s1 + $0x20] ss:$8 sps:$4 sm:$0xff]   ;;  %v1530_v35 = vld [vmem:[%s1959_s1 + $0x34] ss:$8 sps:$4 sm:$0xff]   ;;  %v1532_v36 = vld [vmem:[%s1959_s1 + $0x30] ss:$8 sps:$4 sm:$0xff]  }
  0x2f   :  { %363 = vmatprep.subr.bf16.mxu0 %v1587_v1  ;;  %1015 = vmatprep.subr.bf16.mxu1 %v1587_v1  ;;  %v1533_v37 = vld [vmem:[%s1959_s1 + $0x44] ss:$8 sps:$4 sm:$0xff]   ;;  %v1535_v38 = vld [vmem:[%s1959_s1 + $0x40] ss:$8 sps:$4 sm:$0xff]   ;;  %v1536_v39 = vld [vmem:[%s1959_s1 + $0x54] ss:$8 sps:$4 sm:$0xff]  }
  0x30   :  { %v1538_v40 = vld [vmem:[%s1959_s1 + $0x50] ss:$8 sps:$4 sm:$0xff]   ;;  %v1539_v41 = vld [vmem:[%s1959_s1 + $0x64] ss:$8 sps:$4 sm:$0xff]   ;;  %v1541_v42 = vld [vmem:[%s1959_s1 + $0x60] ss:$8 sps:$4 sm:$0xff]  }
  0x31   :  { %v1542_v43 = vld [vmem:[%s1959_s1 + $0x74] ss:$8 sps:$4 sm:$0xff]   ;;  %v1544_v44 = vld [vmem:[%s1959_s1 + $0x70] ss:$8 sps:$4 sm:$0xff]   ;;  %v1545_v45 = vld [vmem:[%s1959_s1 + $0x84] ss:$8 sps:$4 sm:$0xff]  }
  0x32   :  { %364 = vmatpush1.bf16.msra.mxu0 %v337_v28  ;;  %1016 = vmatpush1.bf16.msra.mxu1 %v989_v29  ;;  %v1547_v46 = vld [vmem:[%s1959_s1 + $0x80] ss:$8 sps:$4 sm:$0xff]   ;;  %v1548_v47 = vld [vmem:[%s1959_s1 + $0x94] ss:$8 sps:$4 sm:$0xff]   ;;  %v1550_v48 = vld [vmem:[%s1959_s1 + $0x90] ss:$8 sps:$4 sm:$0xff]  }
  0x33   :  { %v1551_v49 = vld [vmem:[%s1959_s1 + $0xa4] ss:$8 sps:$4 sm:$0xff]   ;;  %v1553_v50 = vld [vmem:[%s1959_s1 + $0xa0] ss:$8 sps:$4 sm:$0xff]   ;;  %v1554_v51 = vld [vmem:[%s1959_s1 + $0xb4] ss:$8 sps:$4 sm:$0xff]  }
  0x34   :  { %v1556_v52 = vld [vmem:[%s1959_s1 + $0xb0] ss:$8 sps:$4 sm:$0xff]   ;;  %v1557_v53 = vld [vmem:[%s1959_s1 + $0xc4] ss:$8 sps:$4 sm:$0xff]   ;;  %v1559_v54 = vld [vmem:[%s1959_s1 + $0xc0] ss:$8 sps:$4 sm:$0xff]  }
  0x35   :  { %372 = vmatmul.mubr.bf16.vlgmr.msra.gmra.mrb[0].mxu0 %v1521_v30  ;;  %1024 = vmatmul.mubr.bf16.vlgmr.msra.gmra.mrb[0].mxu1 %v1521_v30  ;;  %v1560_v55 = vld [vmem:[%s1959_s1 + $0xd4] ss:$8 sps:$4 sm:$0xff]   ;;  %v1562_v56 = vld [vmem:[%s1959_s1 + $0xd0] ss:$8 sps:$4 sm:$0xff]   ;;  %s1588_s1 = smov 127   ;;  %s1589_s24 = smov 126  }
  0x36   :  { %1393 = vmatprep.mubr.msk.bf16.mxu0 %vm292_vm0, %v1524_v31  ;;  %1474 = vmatprep.mubr.msk.bf16.mxu1 %vm292_vm0, %v1524_v31  ;;  %s1590_s25 = smov 125   ;;  %s1591_s0 = smov 124   ;;  %vm636_vm2 = vcmask 818176   ;;  %vm683_vm3 = vcmask 7168   ;;  %vm686_vm4 = vcmask 8192  }
  0x37   :  { %s1592_s26 = smov 123   ;;  %s1593_s27 = smov 122  }
  0x3d   :  { %380 = vmatmul.mubr.bf16.gmra.mrb[4].mxu0 %v1526_v32  ;;  %1032 = vmatmul.mubr.bf16.gmra.mrb[4].mxu1 %v1526_v32 }
  0x3e   :  { %1394 = vmatprep.mubr.msk.bf16.mxu0 %vm292_vm0, %v1527_v33  ;;  %1475 = vmatprep.mubr.msk.bf16.mxu1 %vm292_vm0, %v1527_v33 }
  0x45   :  { %388 = vmatmul.mubr.bf16.gmra.mrb[8].mxu0 %v1529_v34  ;;  %1040 = vmatmul.mubr.bf16.gmra.mrb[8].mxu1 %v1529_v34 }
  0x46   :  { %1395 = vmatprep.mubr.msk.bf16.mxu0 %vm292_vm0, %v1530_v35  ;;  %1476 = vmatprep.mubr.msk.bf16.mxu1 %vm292_vm0, %v1530_v35 }
  0x4d   :  { %396 = vmatmul.mubr.bf16.gmra.mrb[12].mxu0 %v1532_v36  ;;  %1048 = vmatmul.mubr.bf16.gmra.mrb[12].mxu1 %v1532_v36 }
  0x4e   :  { %1396 = vmatprep.mubr.msk.bf16.mxu0 %vm292_vm0, %v1533_v37  ;;  %1477 = vmatprep.mubr.msk.bf16.mxu1 %vm292_vm0, %v1533_v37 }
  0x55   :  { %404 = vmatmul.mubr.bf16.gmra.mrb[16].mxu0 %v1535_v38  ;;  %1056 = vmatmul.mubr.bf16.gmra.mrb[16].mxu1 %v1535_v38 }
  0x56   :  { %1397 = vmatprep.mubr.msk.bf16.mxu0 %vm292_vm0, %v1536_v39  ;;  %1478 = vmatprep.mubr.msk.bf16.mxu1 %vm292_vm0, %v1536_v39 }
  0x5d   :  { %412 = vmatmul.mubr.bf16.gmra.mrb[20].mxu0 %v1538_v40  ;;  %1064 = vmatmul.mubr.bf16.gmra.mrb[20].mxu1 %v1538_v40 }
  0x5e   :  { %1398 = vmatprep.mubr.msk.bf16.mxu0 %vm292_vm0, %v1539_v41  ;;  %1479 = vmatprep.mubr.msk.bf16.mxu1 %vm292_vm0, %v1539_v41 }
  0x65   :  { %420 = vmatmul.mubr.bf16.gmra.mrb[24].mxu0 %v1541_v42  ;;  %1072 = vmatmul.mubr.bf16.gmra.mrb[24].mxu1 %v1541_v42 }
  0x66   :  { %1399 = vmatprep.mubr.msk.bf16.mxu0 %vm292_vm0, %v1542_v43  ;;  %1480 = vmatprep.mubr.msk.bf16.mxu1 %vm292_vm0, %v1542_v43 }
  0x6d   :  { %428 = vmatmul.mubr.bf16.gmra.mrb[28].mxu0 %v1544_v44  ;;  %1080 = vmatmul.mubr.bf16.gmra.mrb[28].mxu1 %v1544_v44 }
  0x6e   :  { %1400 = vmatprep.mubr.msk.bf16.mxu0 %vm292_vm0, %v1545_v45  ;;  %1481 = vmatprep.mubr.msk.bf16.mxu1 %vm292_vm0, %v1545_v45 }
  0x75   :  { %436 = vmatmul.mubr.bf16.gmra.mrb[32].mxu0 %v1547_v46  ;;  %1088 = vmatmul.mubr.bf16.gmra.mrb[32].mxu1 %v1547_v46 }
  0x76   :  { %1401 = vmatprep.mubr.msk.bf16.mxu0 %vm292_vm0, %v1548_v47  ;;  %1482 = vmatprep.mubr.msk.bf16.mxu1 %vm292_vm0, %v1548_v47 }
  0x7d   :  { %444 = vmatmul.mubr.bf16.gmra.mrb[36].mxu0 %v1550_v48  ;;  %1096 = vmatmul.mubr.bf16.gmra.mrb[36].mxu1 %v1550_v48 }
  0x7e   :  { %1402 = vmatprep.mubr.msk.bf16.mxu0 %vm292_vm0, %v1551_v49  ;;  %1483 = vmatprep.mubr.msk.bf16.mxu1 %vm292_vm0, %v1551_v49 }
  0x85   :  { %452 = vmatmul.mubr.bf16.gmra.mrb[40].mxu0 %v1553_v50  ;;  %1104 = vmatmul.mubr.bf16.gmra.mrb[40].mxu1 %v1553_v50 }
  0x86   :  { %1403 = vmatprep.mubr.msk.bf16.mxu0 %vm292_vm0, %v1554_v51  ;;  %1484 = vmatprep.mubr.msk.bf16.mxu1 %vm292_vm0, %v1554_v51 }
  0x8d   :  { %460 = vmatmul.mubr.bf16.gmra.mrb[44].mxu0 %v1556_v52  ;;  %1112 = vmatmul.mubr.bf16.gmra.mrb[44].mxu1 %v1556_v52 }
  0x8e   :  { %1404 = vmatprep.mubr.msk.bf16.mxu0 %vm292_vm0, %v1557_v53  ;;  %1485 = vmatprep.mubr.msk.bf16.mxu1 %vm292_vm0, %v1557_v53 }
  0x95   :  { %468 = vmatmul.mubr.bf16.gmra.mrb[48].mxu0 %v1559_v54  ;;  %1120 = vmatmul.mubr.bf16.gmra.mrb[48].mxu1 %v1559_v54 }
  0x96   :  { %1405 = vmatprep.mubr.msk.bf16.mxu0 %vm292_vm0, %v1560_v55  ;;  %1486 = vmatprep.mubr.msk.bf16.mxu1 %vm292_vm0, %v1560_v55 }
  0x9d   :  { %476 = vmatmul.mubr.bf16.gmra.mrb[52].mxu0 %v1562_v56  ;;  %1128 = vmatmul.mubr.bf16.gmra.mrb[52].mxu1 %v1562_v56 }
 0x108   :  { %v1841_v57 = vpop.f32.mrb[0].mxu0  ;;  %v1843_v59 = vpop.f32.mrb[0].mxu1 }
 0x109   :  { %v375_v58 = vpop.f32.mrb[1].mxu0  ;;  %v1027_v61 = vpop.f32.mrb[1].mxu1 }
 0x10a   :  { %v1845_v60 = vpop.f32.mrb[2].mxu0  ;;  %v1847_v63 = vpop.f32.mrb[2].mxu1 }
 0x10b   :  { %v378_v62 = vpop.f32.mrb[3].mxu0  ;;  %v1030_v0 = vpop.f32.mrb[3].mxu1 }
 0x110   :  { %v1849_v1 = vpop.f32.mrb[4].mxu0  ;;  %v1851_v3 = vpop.f32.mrb[4].mxu1 }
 0x111   :  { %v383_v2 = vpop.f32.mrb[5].mxu0  ;;  %v1035_v5 = vpop.f32.mrb[5].mxu1 }
 0x112   :  { %v1853_v4 = vpop.f32.mrb[6].mxu0  ;;  %v1855_v7 = vpop.f32.mrb[6].mxu1 }
 0x113   :  { %v386_v6 = vpop.f32.mrb[7].mxu0  ;;  %v1038_v8 = vpop.f32.mrb[7].mxu1 }
 0x118   :  { %v389_v9 = vpop.f32.mrb[8].mxu0  ;;  %v1041_v10 = vpop.f32.mrb[8].mxu1 }
 0x119   :  { %492 = vrot.lane.b32.xlu0 %v389_v9, %s1588_s1  ;;  %v391_v11 = vpop.f32.mrb[9].mxu0  ;;  %1144 = vrot.lane.b32.xlu1 %v1041_v10, %s1588_s1  ;;  %v1043_v13 = vpop.f32.mrb[9].mxu1 }
 0x11a   :  { %v392_v12 = vpop.f32.mrb[10].mxu0  ;;  %v1044_v15 = vpop.f32.mrb[10].mxu1 }
 0x11b   :  { %v394_v14 = vpop.f32.mrb[11].mxu0  ;;  %v1046_v16 = vpop.f32.mrb[11].mxu1 }
 0x11d   :  { %494 = vrot.lane.b32.xlu0 %v392_v12, %s1588_s1  ;;  %1146 = vrot.lane.b32.xlu1 %v1044_v15, %s1588_s1 }
 0x120   :  { %v397_v17 = vpop.f32.mrb[12].mxu0  ;;  %v1049_v18 = vpop.f32.mrb[12].mxu1 }
 0x121   :  { %496 = vrot.lane.b32.xlu0 %v397_v17, %s1588_s1  ;;  %v399_v19 = vpop.f32.mrb[13].mxu0  ;;  %1148 = vrot.lane.b32.xlu1 %v1049_v18, %s1588_s1  ;;  %v1051_v21 = vpop.f32.mrb[13].mxu1 }
 0x122   :  { %v400_v20 = vpop.f32.mrb[14].mxu0  ;;  %v1052_v23 = vpop.f32.mrb[14].mxu1 }
 0x123   :  { %v402_v22 = vpop.f32.mrb[15].mxu0  ;;  %v1054_v24 = vpop.f32.mrb[15].mxu1 }
 0x125   :  { %498 = vrot.lane.b32.xlu0 %v400_v20, %s1588_s1 }
 0x128   :  { %v405_v25 = vpop.f32.mrb[16].mxu0  ;;  %v1057_v26 = vpop.f32.mrb[16].mxu1 }
 0x129   :  { %1150 = vrot.lane.b32.xlu0 %v1052_v23, %s1588_s1  ;;  %512 = vrot.lane.b32.xlu1 %v405_v25, %s1589_s24  ;;  %v407_v27 = vpop.f32.mrb[17].mxu0  ;;  %v1059_v29 = vpop.f32.mrb[17].mxu1 }
 0x12a   :  { %v408_v28 = vpop.f32.mrb[18].mxu0  ;;  %v1060_v31 = vpop.f32.mrb[18].mxu1 }
 0x12b   :  { %v410_v30 = vpop.f32.mrb[19].mxu0  ;;  %v1062_v32 = vpop.f32.mrb[19].mxu1 }
 0x12d   :  { %1164 = vrot.lane.b32.xlu0 %v1057_v26, %s1589_s24  ;;  %1166 = vrot.lane.b32.xlu1 %v1060_v31, %s1589_s24 }
 0x130   :  { %v413_v33 = vpop.f32.mrb[20].mxu0  ;;  %v1065_v35 = vpop.f32.mrb[20].mxu1 }
 0x131   :  { %514 = vrot.lane.b32.xlu0 %v408_v28, %s1589_s24  ;;  %516 = vrot.lane.b32.xlu1 %v413_v33, %s1589_s24  ;;  %v415_v34 = vpop.f32.mrb[21].mxu0  ;;  %v1067_v37 = vpop.f32.mrb[21].mxu1 }
 0x132   :  { %v416_v36 = vpop.f32.mrb[22].mxu0  ;;  %v1068_v39 = vpop.f32.mrb[22].mxu1 }
 0x133   :  { %v418_v38 = vpop.f32.mrb[23].mxu0  ;;  %v1070_v40 = vpop.f32.mrb[23].mxu1 }
 0x135   :  { %1168 = vrot.lane.b32.xlu1 %v1065_v35, %s1589_s24  ;;  %518 = vrot.lane.b32.xlu0 %v416_v36, %s1589_s24 }
 0x138   :  { %v421_v41 = vpop.f32.mrb[24].mxu0  ;;  %v1073_v43 = vpop.f32.mrb[24].mxu1 }
 0x139   :  { %1170 = vrot.lane.b32.xlu0 %v1068_v39, %s1589_s24  ;;  %v423_v42 = vpop.f32.mrb[25].mxu0  ;;  %v1075_v45 = vpop.f32.mrb[25].mxu1 }
 0x13a   :  { %v424_v44 = vpop.f32.mrb[26].mxu0  ;;  %v1076_v47 = vpop.f32.mrb[26].mxu1 }
 0x13b   :  { %534 = vrot.lane.b32.xlu1 %v424_v44, %s1590_s25  ;;  %v426_v46 = vpop.f32.mrb[27].mxu0  ;;  %v1078_v48 = vpop.f32.mrb[27].mxu1 }
 0x13d   :  { %532 = vrot.lane.b32.xlu0 %v421_v41, %s1590_s25 }
 0x13f   :  { %1186 = vrot.lane.b32.xlu1 %v1076_v47, %s1590_s25 }
 0x140   :  { %v429_v49 = vpop.f32.mrb[28].mxu0  ;;  %v1081_v51 = vpop.f32.mrb[28].mxu1 }
 0x141   :  { %1184 = vrot.lane.b32.xlu0 %v1073_v43, %s1590_s25  ;;  %v431_v50 = vpop.f32.mrb[29].mxu0  ;;  %v1083_v53 = vpop.f32.mrb[29].mxu1 }
 0x142   :  { %v432_v52 = vpop.f32.mrb[30].mxu0  ;;  %v1084_v55 = vpop.f32.mrb[30].mxu1 }
 0x143   :  { %536 = vrot.lane.b32.xlu1 %v429_v49, %s1590_s25  ;;  %v434_v54 = vpop.f32.mrb[31].mxu0  ;;  %v1086_v56 = vpop.f32.mrb[31].mxu1  ;;  %v22_v49 = vld [vmem:[%s1960_s2] sm:$0xff] }
 0x144   :  { %v484_v50 = vadd.f32 %v1841_v57, %v22_v49 }
 0x145   :  { %538 = vrot.lane.b32.xlu0 %v432_v52, %s1590_s25  ;;  %v23_v52 = vld [vmem:[%s1960_s2 + $0x8] sm:$0xff] }
 0x147   :  { %1188 = vrot.lane.b32.xlu1 %v1081_v51, %s1590_s25  ;;  %v1136_v51 = vadd.f32 %v1843_v59, %v22_v49 }
 0x148   :  { %v437_v58 = vpop.f32.mrb[32].mxu0  ;;  %v1089_v62 = vpop.f32.mrb[32].mxu1 }
 0x149   :  { %1190 = vrot.lane.b32.xlu0 %v1084_v55, %s1590_s25  ;;  %v439_v61 = vpop.f32.mrb[33].mxu0  ;;  %v1091_v2 = vpop.f32.mrb[33].mxu1 }
 0x14a   :  { %v440_v0 = vpop.f32.mrb[34].mxu0  ;;  %v1092_v6 = vpop.f32.mrb[34].mxu1  ;;  %v1137_v61 = vadd.f32 %v1847_v63, %v23_v52 }
 0x14b   :  { %554 = vrot.lane.b32.xlu1 %v440_v0, %s1591_s0  ;;  %v442_v5 = vpop.f32.mrb[35].mxu0  ;;  %v1094_v8 = vpop.f32.mrb[35].mxu1 }
 0x14c   :  { %v25_v8 = vld [vmem:[%s1960_s2 + $0x18] sm:$0xff] }
 0x14d   :  { %552 = vrot.lane.b32.xlu0 %v437_v58, %s1591_s0  ;;  %v485_v58 = vadd.f32 %v1845_v60, %v23_v52 }
 0x14f   :  { %1206 = vrot.lane.b32.xlu1 %v1092_v6, %s1591_s0 }
 0x150   :  { %v445_v9 = vpop.f32.mrb[36].mxu0  ;;  %v1097_v11 = vpop.f32.mrb[36].mxu1 }
 0x151   :  { %1204 = vrot.lane.b32.xlu0 %v1089_v62, %s1591_s0  ;;  %v447_v10 = vpop.f32.mrb[37].mxu0  ;;  %v1099_v13 = vpop.f32.mrb[37].mxu1  ;;  %v24_v62 = vld [vmem:[%s1960_s2 + $0x10] sm:$0xff] }
 0x152   :  { %v448_v12 = vpop.f32.mrb[38].mxu0  ;;  %v1100_v15 = vpop.f32.mrb[38].mxu1  ;;  %v486_v5 = vadd.f32 %v1849_v1, %v24_v62  ;;  %v1138_v6 = vadd.f32 %v1851_v3, %v24_v62 }
 0x153   :  { %556 = vrot.lane.b32.xlu1 %v445_v9, %s1591_s0  ;;  %v450_v14 = vpop.f32.mrb[39].mxu0  ;;  %v1102_v16 = vpop.f32.mrb[39].mxu1 }
 0x154   :  { %v1139_v14 = vadd.f32 %v1855_v7, %v25_v8 }
 0x155   :  { %558 = vrot.lane.b32.xlu0 %v448_v12, %s1591_s0 }
 0x157   :  { %1208 = vrot.lane.b32.xlu1 %v1097_v11, %s1591_s0  ;;  %v487_v11 = vadd.f32 %v1853_v4, %v25_v8 }
 0x158   :  { %v453_v17 = vpop.f32.mrb[40].mxu0  ;;  %v1105_v19 = vpop.f32.mrb[40].mxu1 }
 0x159   :  { %1210 = vrot.lane.b32.xlu0 %v1100_v15, %s1591_s0  ;;  %v455_v18 = vpop.f32.mrb[41].mxu0  ;;  %v1107_v21 = vpop.f32.mrb[41].mxu1  ;;  %s1594_s0 = smov [#allocation2]  }
 0x15a   :  { %v456_v20 = vpop.f32.mrb[42].mxu0  ;;  %v1108_v23 = vpop.f32.mrb[42].mxu1 }
 0x15b   :  { %574 = vrot.lane.b32.xlu1 %v456_v20, %s1592_s26  ;;  %v458_v22 = vpop.f32.mrb[43].mxu0  ;;  %v1110_v24 = vpop.f32.mrb[43].mxu1 }
 0x15d   :  { %572 = vrot.lane.b32.xlu0 %v453_v17, %s1592_s26 }
 0x15f   :  { %1226 = vrot.lane.b32.xlu1 %v1108_v23, %s1592_s26 }
 0x160   :  { %v461_v25 = vpop.f32.mrb[44].mxu0  ;;  %v1113_v27 = vpop.f32.mrb[44].mxu1 }
 0x161   :  { %1224 = vrot.lane.b32.xlu0 %v1105_v19, %s1592_s26  ;;  %v463_v26 = vpop.f32.mrb[45].mxu0  ;;  %v1115_v29 = vpop.f32.mrb[45].mxu1 }
 0x162   :  { %v464_v28 = vpop.f32.mrb[46].mxu0  ;;  %v1116_v31 = vpop.f32.mrb[46].mxu1 }
 0x163   :  { %576 = vrot.lane.b32.xlu1 %v461_v25, %s1592_s26  ;;  %v466_v30 = vpop.f32.mrb[47].mxu0  ;;  %v1118_v32 = vpop.f32.mrb[47].mxu1 }
 0x165   :  { %578 = vrot.lane.b32.xlu0 %v464_v28, %s1592_s26 }
 0x167   :  { %1228 = vrot.lane.b32.xlu1 %v1113_v27, %s1592_s26 }
 0x168   :  { %v469_v33 = vpop.f32.mrb[48].mxu0  ;;  %v1121_v35 = vpop.f32.mrb[48].mxu1 }
 0x169   :  { %1230 = vrot.lane.b32.xlu0 %v1116_v31, %s1592_s26  ;;  %v471_v34 = vpop.f32.mrb[49].mxu0  ;;  %v1123_v37 = vpop.f32.mrb[49].mxu1  ;;  %s1343_s26 = sshll.u32 %s1594_s0, 4  ;;  %s1344_s26 = int_to_ptr.vmem [resolvable:$true] %s1343_s26 }
 0x16a   :  { %v472_v36 = vpop.f32.mrb[50].mxu0  ;;  %v1124_v39 = vpop.f32.mrb[50].mxu1  ;;  %p1568_p1 = scmp.lt.s32.totalorder %s1344_s26, %s1344_s26 }
 0x16b   :  { %594 = vrot.lane.b32.xlu1 %v472_v36, %s1593_s27  ;;  %v474_v38 = vpop.f32.mrb[51].mxu0  ;;  %v1126_v40 = vpop.f32.mrb[51].mxu1 }
 0x16d   :  { %592 = vrot.lane.b32.xlu0 %v469_v33, %s1593_s27 }
 0x16f   :  { %1246 = vrot.lane.b32.xlu1 %v1124_v39, %s1593_s27 }
 0x170   :  { %v477_v41 = vpop.f32.mrb[52].mxu0  ;;  %v1129_v43 = vpop.f32.mrb[52].mxu1 }
 0x171   :  { %1244 = vrot.lane.b32.xlu0 %v1121_v35, %s1593_s27  ;;  %v479_v42 = vpop.f32.mrb[53].mxu0  ;;  %v1131_v45 = vpop.f32.mrb[53].mxu1 }
 0x172   :  { %v480_v44 = vpop.f32.mrb[54].mxu0  ;;  %v1132_v46 = vpop.f32.mrb[54].mxu1 }
 0x173   :  { %596 = vrot.lane.b32.xlu1 %v477_v41, %s1593_s27  ;;  %v482_v47 = vpop.f32.mrb[55].mxu0  ;;  %v1134_v48 = vpop.f32.mrb[55].mxu1 }
 0x175   :  { %598 = vrot.lane.b32.xlu0 %v480_v44, %s1593_s27 }
 0x177   :  { %1248 = vrot.lane.b32.xlu1 %v1129_v43, %s1593_s27 }
 0x17b   :  { %1250 = vrot.lane.b32.xlu1 %v1132_v46, %s1593_s27  ;;  %s1563_s27 = scalar_lea.vmem %s1344_s26, 32 }
 0x17c   :  { %p1564_p0 = scmp.ne.s32.totalorder %s1344_s26, %s1563_s27  ;;  %p1569_p2 = scmp.lt.s32.totalorder %s1563_s27, %s1563_s27 }
 0x17e   :  { %p1570_p3 = por %p1569_p2, %p1568_p1 }
 0x180   :  { %p1571_p4 = pnand %p1570_p3, %p1564_p0 }
 0x18b   :  { %v493_v53 = vpop.permute.xlu0 %492  ;;  %v1145_v54 = vpop.permute.xlu1 %1144 }
 0x18c   :  { %v504_v55 = vadd.f32 %v493_v53, %v484_v50  ;;  %v1156_v56 = vadd.f32 %v1145_v54, %v1136_v51 }
 0x18f   :  { %v495_v0 = vpop.permute.xlu0 %494  ;;  %v1147_v57 = vpop.permute.xlu1 %1146 }
 0x190   :  { %v505_v2 = vadd.f32 %v495_v0, %v485_v58  ;;  %v1157_v59 = vadd.f32 %v1147_v57, %v1137_v61 }
 0x193   :  { %v497_v9 = vpop.permute.xlu0 %496  ;;  %v1149_v60 = vpop.permute.xlu1 %1148 }
 0x194   :  { %v506_v10 = vadd.f32 %v497_v9, %v486_v5  ;;  %v1158_v63 = vadd.f32 %v1149_v60, %v1138_v6 }
 0x197   :  { %v499_v12 = vpop.permute.xlu0 %498 }
 0x198   :  { %v1884_v13 = vadd.f32 %v499_v12, %v487_v11 }
 0x19b   :  { %v1151_v15 = vpop.permute.xlu0 %1150  ;;  %v513_v16 = vpop.permute.xlu1 %512 }
 0x19c   :  { %v1887_v1 = vadd.f32 %v1151_v15, %v1139_v14  ;;  %v524_v44 = vadd.f32 %v513_v16, %v504_v55 }
 0x19f   :  { %v1165_v3 = vpop.permute.xlu0 %1164  ;;  %v1167_v17 = vpop.permute.xlu1 %1166 }
 0x1a0   :  { %v1177_v47 = vadd.f32 %v1167_v17, %v1157_v59  ;;  %v1176_v51 = vadd.f32 %v1165_v3, %v1156_v56 }
 0x1a3   :  { %v515_v18 = vpop.permute.xlu0 %514  ;;  %v517_v19 = vpop.permute.xlu1 %516 }
 0x1a4   :  { %v525_v42 = vadd.f32 %v515_v18, %v505_v2  ;;  %v526_v6 = vadd.f32 %v517_v19, %v506_v10 }
 0x1a7   :  { %v519_v20 = vpop.permute.xlu0 %518  ;;  %v1169_v21 = vpop.permute.xlu1 %1168 }
 0x1a8   :  { %v1178_v9 = vadd.f32 %v1169_v21, %v1158_v63  ;;  %v527_v14 = vadd.f32 %v519_v20, %v1884_v13 }
 0x1ab   :  { %v1171_v22 = vpop.permute.xlu0 %1170 }
 0x1ac   :  { %v1179_v17 = vadd.f32 %v1171_v22, %v1887_v1 }
 0x1ad   :  { %v535_v23 = vpop.permute.xlu1 %534 }
 0x1ae   :  { %v545_v45 = vadd.f32 %v535_v23, %v525_v42 }
 0x1af   :  { %v533_v24 = vpop.permute.xlu0 %532 }
 0x1b0   :  { %v544_v48 = vadd.f32 %v533_v24, %v524_v44 }
 0x1b1   :  { %v1187_v25 = vpop.permute.xlu1 %1186 }
 0x1b2   :  { %v1197_v52 = vadd.f32 %v1187_v25, %v1177_v47 }
 0x1b3   :  { %v1185_v4 = vpop.permute.xlu0 %1184 }
 0x1b4   :  { %v1196_v61 = vadd.f32 %v1185_v4, %v1176_v51 }
 0x1b5   :  { %v537_v26 = vpop.permute.xlu1 %536 }
 0x1b6   :  { %v546_v60 = vadd.f32 %v537_v26, %v526_v6 }
 0x1b7   :  { %v539_v27 = vpop.permute.xlu0 %538 }
 0x1b8   :  { %v547_v18 = vadd.f32 %v539_v27, %v527_v14 }
 0x1b9   :  { %v1189_v28 = vpop.permute.xlu1 %1188 }
 0x1ba   :  { %v1198_v15 = vadd.f32 %v1189_v28, %v1178_v9 }
 0x1bb   :  { %v1191_v29 = vpop.permute.xlu0 %1190 }
 0x1bc   :  { %v1199_v63 = vadd.f32 %v1191_v29, %v1179_v17 }
 0x1bd   :  { %v555_v7 = vpop.permute.xlu1 %554 }
 0x1be   :  { %v565_v49 = vadd.f32 %v555_v7, %v545_v45  ;;  %v31_v45 = vld [vmem:[%s1961_s3 + $0x28] sm:$0xff] }
 0x1bf   :  { %v553_v30 = vpop.permute.xlu0 %552 }
 0x1c0   :  { %v564_v53 = vadd.f32 %v553_v30, %v544_v48 }
 0x1c1   :  { %v1207_v31 = vpop.permute.xlu1 %1206 }
 0x1c2   :  { %v1217_v62 = vadd.f32 %v1207_v31, %v1197_v52 }
 0x1c3   :  { %v1205_v32 = vpop.permute.xlu0 %1204 }
 0x1c4   :  { %v1216_v2 = vadd.f32 %v1205_v32, %v1196_v61 }
 0x1c5   :  { %v557_v33 = vpop.permute.xlu1 %556 }
 0x1c6   :  { %v566_v16 = vadd.f32 %v557_v33, %v546_v60  ;;  %v26_v33 = vld [vmem:[%s1961_s3] sm:$0xff] }
 0x1c7   :  { %v559_v34 = vpop.permute.xlu0 %558 }
 0x1c8   :  { %v567_v21 = vadd.f32 %v559_v34, %v547_v18 }
 0x1c9   :  { %v1209_v35 = vpop.permute.xlu1 %1208 }
 0x1ca   :  { %v1218_v19 = vadd.f32 %v1209_v35, %v1198_v15 }
 0x1cb   :  { %v1211_v36 = vpop.permute.xlu0 %1210 }
 0x1cc   :  { %v1219_v13 = vadd.f32 %v1211_v36, %v1199_v63 }
 0x1cd   :  { %v575_v37 = vpop.permute.xlu1 %574 }
 0x1ce   :  { %v585_v54 = vadd.f32 %v575_v37, %v565_v49  ;;  %v30_v37 = vld [vmem:[%s1961_s3 + $0x20] sm:$0xff] }
 0x1cf   :  { %v573_v38 = vpop.permute.xlu0 %572 }
 0x1d0   :  { %v584_v0 = vadd.f32 %v573_v38, %v564_v53 }
 0x1d1   :  { %v1227_v39 = vpop.permute.xlu1 %1226 }
 0x1d2   :  { %v1237_v8 = vadd.f32 %v1227_v39, %v1217_v62 }
 0x1d3   :  { %v1225_v40 = vpop.permute.xlu0 %1224 }
 0x1d4   :  { %v1236_v11 = vadd.f32 %v1225_v40, %v1216_v2 }
 0x1d5   :  { %v577_v41 = vpop.permute.xlu1 %576 }
 0x1d6   :  { %v586_v23 = vadd.f32 %v577_v41, %v566_v16 }
 0x1d7   :  { %v579_v43 = vpop.permute.xlu0 %578 }
 0x1d8   :  { %v587_v20 = vadd.f32 %v579_v43, %v567_v21 }
 0x1d9   :  { %v1229_v46 = vpop.permute.xlu1 %1228 }
 0x1da   :  { %v1238_v24 = vadd.f32 %v1229_v46, %v1218_v19  ;;  %v29_v19 = vld [vmem:[%s1961_s3 + $0x18] sm:$0xff] }
 0x1db   :  { %v1231_v50 = vpop.permute.xlu0 %1230 }
 0x1dc   :  { %v1239_v7 = vadd.f32 %v1231_v50, %v1219_v13 }
 0x1dd   :  { %v595_v58 = vpop.permute.xlu1 %594 }
 0x1de   :  { %v605_v57 = vadd.f32 %v595_v58, %v585_v54  ;;  %v27_v54 = vld [vmem:[%s1961_s3 + $0x8] sm:$0xff] }
 0x1df   :  { %v593_v5 = vpop.permute.xlu0 %592 }
 0x1e0   :  { %v604_v55 = vadd.f32 %v593_v5, %v584_v0  ;;  %614 = vrot.lane.b32.xlu1 %v605_v57, %s1588_s1 }
 0x1e1   :  { %v1247_v59 = vpop.permute.xlu1 %1246 }
 0x1e2   :  { %v1257_v56 = vadd.f32 %v1247_v59, %v1237_v8  ;;  %612 = vrot.lane.b32.xlu0 %v604_v55, %s1588_s1  ;;  %v28_v8 = vld [vmem:[%s1961_s3 + $0x10] sm:$0xff] }
 0x1e3   :  { %v1245_v12 = vpop.permute.xlu0 %1244 }
 0x1e4   :  { %v1256_v3 = vadd.f32 %v1245_v12, %v1236_v11  ;;  %1266 = vrot.lane.b32.xlu1 %v1257_v56, %s1588_s1  ;;  %v32_v12 = vld [vmem:[%s1961_s3 + $0x30] sm:$0xff] }
 0x1e5   :  { %v597_v10 = vpop.permute.xlu1 %596 }
 0x1e6   :  { %1264 = vrot.lane.b32.xlu0 %v1256_v3, %s1588_s1  ;;  %v606_v25 = vadd.f32 %v597_v10, %v586_v23 }
 0x1e7   :  { %v599_v4 = vpop.permute.xlu0 %598 }
 0x1e8   :  { %v607_v30 = vadd.f32 %v599_v4, %v587_v20  ;;  %v33_v4 = vld [vmem:[%s1961_s3 + $0x38] sm:$0xff] }
 0x1e9   :  { %v1249_v26 = vpop.permute.xlu1 %1248 }
 0x1ea   :  { %v1258_v28 = vadd.f32 %v1249_v26, %v1238_v24  ;;  %616 = vrot.lane.b32.xlu0 %v606_v25, %s1588_s1 }
 0x1ec   :  { %1268 = vrot.lane.b32.xlu1 %v1258_v28, %s1588_s1 }
 0x1ed   :  { %v1251_v1 = vpop.permute.xlu1 %1250 }
 0x1ee   :  { %v1897_v22 = vadd.f32 %v1251_v1, %v1239_v7  ;;  %618 = vrot.lane.b32.xlu0 %v607_v30, %s1588_s1 }
 0x1f0   :  { %1270 = vrot.lane.b32.xlu1 %v1897_v22, %s1588_s1 }
 0x252   :  { %v615_v27 = vpop.permute.xlu1 %614 }
 0x253   :  { %v625_v32 = vmax.f32 %v605_v57, %v615_v27 }
 0x254   :  { %v613_v29 = vpop.permute.xlu0 %612 }
 0x255   :  { %v624_v31 = vmax.f32 %v604_v55, %v613_v29  ;;  %v629_v40 = vmax.f32 %v625_v32, 0.0 }
 0x256   :  { %v1267_v35 = vpop.permute.xlu1 %1266 }
 0x257   :  { %v628_v34 = vmax.f32 %v624_v31, 0.0  ;;  %v1277_v41 = vmax.f32 %v1257_v56, %v1267_v35  ;;  %v659_v49 = vmul.f32 %v629_v40, %v31_v45  ;;  %v633_v62 = vmul.f32 %v629_v40, %v27_v54 }
 0x258   :  { %v1265_v36 = vpop.permute.xlu0 %1264 }
 0x259   :  { %v1276_v38 = vmax.f32 %v1256_v3, %v1265_v36  ;;  %v632_v39 = vmul.f32 %v628_v34, %v26_v33  ;;  %v658_v44 = vmul.f32 %v628_v34, %v30_v37  ;;  %v1281_v48 = vmax.f32 %v1277_v41, 0.0 }
 0x25a   :  { %v665_v61 = vsel %vm636_vm2, %v659_v49, 0.0  ;;  %v640_v55 = vsel %vm636_vm2, %v633_v62, 0.0 }
 0x25b   :  { %v1280_v42 = vmax.f32 %v1276_v38, 0.0  ;;  %v637_v43 = vsel %vm636_vm2, %v632_v39, 0.0  ;;  %v662_v51 = vsel %vm636_vm2, %v658_v44, 0.0  ;;  %v1285_v6 = vmul.f32 %v1281_v48, %v27_v54 }
 0x25c   :  { %638 = vadd.xlane.f32.xlu0 %v637_v43  ;;  %v617_v46 = vpop.permute.xlu0 %616  ;;  %v1310_v59 = vmul.f32 %v1281_v48, %v31_v45 }
 0x25d   :  { %v1284_v47 = vmul.f32 %v1280_v42, %v26_v33  ;;  %v626_v50 = vmax.f32 %v606_v25, %v617_v46  ;;  %v1309_v53 = vmul.f32 %v1280_v42, %v30_v37  ;;  %v1291_v11 = vsel %vm636_vm2, %v1285_v6, 0.0 }
 0x25e   :  { %v1269_v58 = vpop.permute.xlu1 %1268  ;;  %v1316_v15 = vsel %vm636_vm2, %v1310_v59, 0.0 }
 0x25f   :  { %v1288_v52 = vsel %vm636_vm2, %v1284_v47, 0.0  ;;  %v630_v0 = vmax.f32 %v626_v50, 0.0  ;;  %v1278_v57 = vmax.f32 %v1258_v28, %v1269_v58  ;;  %v1313_v5 = vsel %vm636_vm2, %v1309_v53, 0.0 }
 0x260   :  { %663 = vadd.xlane.f32.xlu0 %v662_v51  ;;  %1289 = vadd.xlane.f32.xlu1 %v1288_v52  ;;  %v619_v2 = vpop.permute.xlu0 %618 }
 0x261   :  { %v1282_v9 = vmax.f32 %v1278_v57, 0.0  ;;  %v627_v60 = vmax.f32 %v607_v30, %v619_v2  ;;  %v634_v56 = vmul.f32 %v630_v0, %v28_v8  ;;  %v660_v16 = vmul.f32 %v630_v0, %v32_v12 }
 0x262   :  { %v1271_v14 = vpop.permute.xlu1 %1270 }
 0x263   :  { %v631_v3 = vmax.f32 %v627_v60, 0.0  ;;  %v1279_v10 = vmax.f32 %v1897_v22, %v1271_v14  ;;  %v643_v17 = vsel %vm636_vm2, %v634_v56, 0.0  ;;  %v1286_v18 = vmul.f32 %v1282_v9, %v28_v8 }
 0x264   :  { %666 = vadd.xlane.f32.xlu0 %v665_v61  ;;  %1314 = vadd.xlane.f32.xlu1 %v1313_v5  ;;  %v668_v23 = vsel %vm636_vm2, %v660_v16, 0.0  ;;  %v1311_v24 = vmul.f32 %v1282_v9, %v32_v12 }
 0x265   :  { %v1283_v63 = vmax.f32 %v1279_v10, 0.0  ;;  %v1294_v21 = vsel %vm636_vm2, %v1286_v18, 0.0  ;;  %v635_v25 = vmul.f32 %v631_v3, %v29_v19  ;;  %v661_v20 = vmul.f32 %v631_v3, %v33_v4 }
 0x266   :  { %v1319_v26 = vsel %vm636_vm2, %v1311_v24, 0.0 }
 0x267   :  { %v646_v13 = vsel %vm636_vm2, %v635_v25, 0.0  ;;  %v1287_v28 = vmul.f32 %v1283_v63, %v29_v19  ;;  %v671_v7 = vsel %vm636_vm2, %v661_v20, 0.0  ;;  %v1312_v1 = vmul.f32 %v1283_v63, %v33_v4  ;;  %v34_v19 = vld [vmem:[%s1962_s4] sm:$0x1] }
 0x268   :  { %1292 = vadd.xlane.f32.xlu0 %v1291_v11  ;;  %641 = vadd.xlane.f32.xlu1 %v640_v55 }
 0x269   :  { %v1297_v30 = vsel %vm636_vm2, %v1287_v28, 0.0  ;;  %v1322_v22 = vsel %vm636_vm2, %v1312_v1, 0.0 }
 0x26c   :  { %1317 = vadd.xlane.f32.xlu0 %v1316_v15  ;;  %644 = vadd.xlane.f32.xlu1 %v643_v17 }
 0x270   :  { %669 = vadd.xlane.f32.xlu0 %v668_v23  ;;  %1295 = vadd.xlane.f32.xlu1 %v1294_v21 }
 0x274   :  { %1320 = vadd.xlane.f32.xlu0 %v1319_v26  ;;  %647 = vadd.xlane.f32.xlu1 %v646_v13 }
 0x278   :  { %672 = vadd.xlane.f32.xlu0 %v671_v7  ;;  %1298 = vadd.xlane.f32.xlu1 %v1297_v30 }
 0x27c   :  { %1323 = vadd.xlane.f32.xlu0 %v1322_v22 }
 0x2e9   :  { %v639_v27 = vpop.xlane.xlu0 %638 }
 0x2ed   :  { %v1290_v29 = vpop.xlane.xlu1 %1289  ;;  %v664_v31 = vpop.xlane.xlu0 %663 }
 0x2f1   :  { %v1315_v32 = vpop.xlane.xlu1 %1314  ;;  %v667_v33 = vpop.xlane.xlu0 %666 }
 0x2f2   :  { %v674_v44 = vadd.f32 %v667_v33, %v664_v31 }
 0x2f5   :  { %v642_v34 = vpop.xlane.xlu1 %641  ;;  %v1293_v35 = vpop.xlane.xlu0 %1292 }
 0x2f6   :  { %v649_v40 = vadd.f32 %v642_v34, %v639_v27  ;;  %v1300_v45 = vadd.f32 %v1293_v35, %v1290_v29 }
 0x2f9   :  { %v645_v36 = vpop.xlane.xlu1 %644  ;;  %v1318_v37 = vpop.xlane.xlu0 %1317 }
 0x2fa   :  { %v650_v41 = vadd.f32 %v649_v40, %v645_v36  ;;  %v1325_v52 = vadd.f32 %v1318_v37, %v1315_v32 }
 0x2fd   :  { %v1296_v38 = vpop.xlane.xlu1 %1295  ;;  %v670_v39 = vpop.xlane.xlu0 %669 }
 0x2fe   :  { %v1301_v47 = vadd.f32 %v1300_v45, %v1296_v38  ;;  %v675_v48 = vadd.f32 %v674_v44, %v670_v39 }
 0x301   :  { %v648_v42 = vpop.xlane.xlu1 %647  ;;  %v1321_v43 = vpop.xlane.xlu0 %1320 }
 0x302   :  { %v651_v46 = vadd.f32 %v650_v41, %v648_v42  ;;  %v1326_v62 = vadd.f32 %v1325_v52, %v1321_v43 }
 0x304   :  { %v652_v49 = vrot.slane %v651_v46, 4 }
 0x305   :  { %v1299_v50 = vpop.xlane.xlu1 %1298  ;;  %v673_v51 = vpop.xlane.xlu0 %672 }
 0x306   :  { %v653_v53 = vadd.f32 %v652_v49, %v651_v46  ;;  %v1302_v54 = vadd.f32 %v1301_v47, %v1299_v50  ;;  %v676_v58 = vadd.f32 %v675_v48, %v673_v51 }
 0x308   :  { %v654_v61 = vrot.slane %v653_v53, 2  ;;  %v1303_v0 = vrot.slane %v1302_v54, 4  ;;  %v677_v57 = vrot.slane %v676_v58, 4 }
 0x309   :  { %v1324_v5 = vpop.xlane.xlu0 %1323 }
 0x30a   :  { %v655_v6 = vadd.f32 %v654_v61, %v653_v53  ;;  %v1304_v2 = vadd.f32 %v1303_v0, %v1302_v54  ;;  %v678_v8 = vadd.f32 %v677_v57, %v676_v58  ;;  %v1327_v55 = vadd.f32 %v1326_v62, %v1324_v5 }
 0x30c   :  { %v1305_v59 = vrot.slane %v1304_v2, 2  ;;  %v679_v9 = vrot.slane %v678_v8, 2  ;;  %v1328_v60 = vrot.slane %v1327_v55, 4  ;;  %v656_v11 = vrot.slane %v655_v6, 1 }
 0x30e   :  { %v1306_v56 = vadd.f32 %v1305_v59, %v1304_v2  ;;  %v680_v12 = vadd.f32 %v679_v9, %v678_v8  ;;  %v1329_v14 = vadd.f32 %v1328_v60, %v1327_v55  ;;  %v657_v3 = vadd.f32 %v656_v11, %v655_v6 }
 0x310   :  { %v681_v15 = vrot.slane %v680_v12, 1  ;;  %v1330_v16 = vrot.slane %v1329_v14, 2  ;;  %v1307_v10 = vrot.slane %v1306_v56, 1 }
 0x312   :  { %v682_v17 = vadd.f32 %v681_v15, %v680_v12  ;;  %v1331_v18 = vadd.f32 %v1330_v16, %v1329_v14  ;;  %v1308_v24 = vadd.f32 %v1307_v10, %v1306_v56 }
 0x314   :  { %v1332_v23 = vrot.slane %v1331_v18, 1  ;;  %v684_v63 = vsel %vm683_vm3, %v657_v3, %v682_v17 }
 0x315   :  { %v685_v21 = vadd.f32 %v684_v63, %v34_v19 }
 0x316   :  { %v1333_v25 = vadd.f32 %v1332_v23, %v1331_v18 }
 0x317   :  { %687 = vst.msk [vmem:[#allocation2] sm:$0x1] %vm686_vm4, %v685_v21 }
 0x318   :  { %v1334_v4 = vsel %vm683_vm3, %v1308_v24, %v1333_v25 }
 0x319   :  { %v1335_v26 = vadd.f32 %v1334_v4, %v34_v19 }
 0x31b   :  { %1336 = vst.msk [vmem:[#allocation2 + $0x1] sm:$0x1] %vm686_vm4, %v1335_v26 }
 0x31c   :  { %1574 = shalt.err (!%p1571_p4)
}
 0x31d   :  { %s1575_s29 = scalar_lea.hbm %s1963_s5, 32 }
 0x31e   :  { %p1576_p5 = scmp.ne.s32.totalorder %s1963_s5, %s1575_s29  ;;  %p1579_p6 = scmp.lt.u32.totalorder %s1575_s29, %s1963_s5 }
 0x320   :  { %p1581_p7 = pnand %p1579_p6, %p1576_p5 }
 0x322   :  { %1584 = shalt.err (!%p1581_p7)
}
 0x323   :  { %1346 = dma.vmem_to_hbm [thread:$0]  %s1344_s26, 32, %s1963_s5, [#allocation3]  }
 0x324   :  { %1585 = dma.done.wait [#allocation3], 32  }
 0x325   :  { %1586 = vsyncadd [#allocation3], 4294967264 }
 0x326   :  { %1350 = vsyncpa [#allocation3], 1 }

</bundles_post_ra>
